<compile_context>
chip_gen: v5e
topology: v5e:2x2
jax: 0.10.0
libtpu: 0.0.40
codegen_flags: <defaults>
</compile_context>

<pallas_src>
import math

import jax
import jax.numpy as jnp
from jax.experimental import pallas as pl
from jax.experimental.pallas import tpu as pltpu

BN_EPS = 1e-5

FC1_UNITS = 400
FC2_UNITS = 300
FC1_PAD = 512   # 4 * 128 lanes
FC2_PAD = 384   # 3 * 128 lanes


def critic_kernel(x_ref, w1_ref, gb1_ref, bw2_ref, b3_ref, w2_hbm,
                  o_ref, w2_vmem, w2_sem):
    # Kick off the dominant DMA (w2, 384 KB bf16) right away so it overlaps
    # with fc1 + BatchNorm below.
    w2_copy = pltpu.make_async_copy(w2_hbm, w2_vmem, w2_sem)
    w2_copy.start()

    # fc1: [B, in] @ [in, 512] on the bf16 MXU path, f32 accumulation.
    # No bias: training-mode BN's mean subtraction cancels it exactly.
    x = x_ref[...].astype(jnp.bfloat16)
    h1 = jnp.dot(x, w1_ref[...], preferred_element_type=jnp.float32)

    # BatchNorm1d (training mode, biased batch statistics), single pass:
    # both reductions depend only on h1 so they overlap on the XLU.
    inv_b = 1.0 / h1.shape[0]
    s1 = jnp.sum(h1, axis=0, keepdims=True)
    s2 = jnp.sum(h1 * h1, axis=0, keepdims=True)
    mean = s1 * inv_b
    var = s2 * inv_b - mean * mean

    gb1 = gb1_ref[...]                      # [2, 512]: row 0 gamma, row 1 beta
    scale = gb1[0:1, :] * jax.lax.rsqrt(var + BN_EPS)   # [1, 512]
    shift = gb1[1:2, :] - mean * scale                  # [1, 512]
    # Padded lanes: h1 = 0, gamma = 0 -> scale = 0, shift = 0 -> stay 0.
    h1 = jnp.maximum(h1 * scale + shift, 0.0)

    # fc2: [B, 512] @ [512, 384] + b2, ReLU.  Wait for the manual w2 DMA only
    # now, after fc1 + BN have hidden most of its latency.
    w2_copy.wait()
    bw2 = bw2_ref[...]                      # [2, 384]: row 0 b2, row 1 w3
    h2 = jnp.dot(h1.astype(jnp.bfloat16), w2_vmem[...],
                 preferred_element_type=jnp.float32) + bw2[0:1, :]
    h2 = jnp.maximum(h2, 0.0)

    # fc3 as VPU multiply + cross-lane reduce (keeps the N=1 op off the MXU).
    out = jnp.sum(h2 * bw2[1:2, :], axis=-1, keepdims=True) + b3_ref[0, 0]
    o_ref[...] = out.astype(o_ref.dtype)


def critic_forward(x, params):
    """x: [B, in_shape] float32. params: dict of weights (see init_params)."""
    b = x.shape[0]
    operands = (
        x,
        params["w1"],
        params["gb1"],
        params["bw2"],
        params["b3"],
        params["w2"],
    )
    vmem_spec = pl.BlockSpec(memory_space=pltpu.MemorySpace.VMEM)
    smem_spec = pl.BlockSpec(memory_space=pltpu.MemorySpace.SMEM)
    any_spec = pl.BlockSpec(memory_space=pl.ANY)   # w2 stays in HBM; manual DMA
    return pl.pallas_call(
        critic_kernel,
        out_shape=jax.ShapeDtypeStruct((b, 1), jnp.float32),
        in_specs=[vmem_spec, vmem_spec, vmem_spec, vmem_spec, smem_spec, any_spec],
        out_specs=vmem_spec,
        scratch_shapes=[
            pltpu.VMEM((FC1_PAD, FC2_PAD), jnp.bfloat16),   # w2 landing buffer
            pltpu.SemaphoreType.DMA(()),
        ],
    )(*operands)


def _xavier_uniform(key, fan_in, fan_out):
    # torch.nn.init.xavier_uniform_ on a [out, in] weight; built here as [in, out].
    limit = math.sqrt(6.0 / (fan_in + fan_out))
    return jax.random.uniform(key, (fan_in, fan_out), jnp.float32, -limit, limit)


def _linear_bias(key, fan_in, fan_out):
    # torch default Linear bias init: U(-1/sqrt(fan_in), 1/sqrt(fan_in))
    bound = 1.0 / math.sqrt(fan_in)
    return jax.random.uniform(key, (1, fan_out), jnp.float32, -bound, bound)


def _pad_cols(a, width):
    return jnp.pad(a, ((0, 0), (0, width - a.shape[1])))


def init_params(key, in_shape, fc1_units=FC1_UNITS, fc2_units=FC2_UNITS):
    k = jax.random.split(key, 5)

    w1 = _xavier_uniform(k[0], in_shape, fc1_units)                       # [in, 400]
    w2 = _xavier_uniform(k[1], fc1_units, fc2_units)                      # [400, 300]
    w3 = jax.random.uniform(k[2], (1, fc2_units), jnp.float32, -0.003, 0.003)  # [1, 300]
    b2 = _linear_bias(k[3], fc1_units, fc2_units)                         # [1, 300]
    b3 = _linear_bias(k[4], fc2_units, 1)                                 # [1, 1]

    # Zero-pad feature dims to lane multiples; padded lanes are inert
    # (0 through BN/ReLU, 0 contribution via zero rows/cols of w2/w3).
    w1_p = _pad_cols(w1, FC1_PAD)                                         # [in, 512]
    w2_p = jnp.pad(w2, ((0, FC1_PAD - fc1_units), (0, FC2_PAD - fc2_units)))  # [512, 384]
    w3_p = _pad_cols(w3, FC2_PAD)                                         # [1, 384]
    b2_p = _pad_cols(b2, FC2_PAD)                                         # [1, 384]

    gamma1 = _pad_cols(jnp.ones((1, fc1_units), jnp.float32), FC1_PAD)    # [1, 512]
    beta1 = jnp.zeros((1, FC1_PAD), jnp.float32)                          # [1, 512]

    params = {
        # bf16 weights on the MXU path (accumulation stays f32 in-kernel).
        "w1": w1_p.astype(jnp.bfloat16),
        "w2": w2_p.astype(jnp.bfloat16),
        # Packed small operands (fewer input DMAs).
        "gb1": jnp.concatenate([gamma1, beta1], axis=0),   # [2, 512] f32
        "bw2": jnp.concatenate([b2_p, w3_p], axis=0),      # [2, 384] f32
        "b3": b3,                                          # [1, 1]  f32 (SMEM)
        # Note: fc1 bias intentionally omitted (cancelled by training-mode BN).
    }
    return params


def critic_reference(x, params):
    """Pure-JAX reference using identical dtypes/casts/math as the kernel."""
    h1 = jnp.dot(x.astype(jnp.bfloat16), params["w1"],
                 preferred_element_type=jnp.float32)
    mean = jnp.mean(h1, axis=0, keepdims=True)
    var = jnp.mean(h1 * h1, axis=0, keepdims=True) - mean * mean
    gb1 = params["gb1"]
    scale = gb1[0:1, :] * jax.lax.rsqrt(var + BN_EPS)
    shift = gb1[1:2, :] - mean * scale
    h1 = jnp.maximum(h1 * scale + shift, 0.0)
    bw2 = params["bw2"]
    h2 = jnp.dot(h1.astype(jnp.bfloat16), params["w2"],
                 preferred_element_type=jnp.float32) + bw2[0:1, :]
    h2 = jnp.maximum(h2, 0.0)
    return jnp.sum(h2 * bw2[1:2, :], axis=-1, keepdims=True) + params["b3"]


if __name__ == "__main__":
    key = jax.random.PRNGKey(0)
    k_param, k_x = jax.random.split(key)

    batch = 8
    state_size, action_size = 24, 8
    in_shape = state_size + action_size  # concat((state, action), dim=1)

    params = init_params(k_param, in_shape)
    x = jax.random.normal(k_x, (batch, in_shape), jnp.float32)

    out = critic_forward(x, params)
    out = jax.block_until_ready(out)

    ref = critic_reference(x, params)
    assert out.shape == (batch, 1)
    assert jnp.allclose(out, ref, atol=1e-4, rtol=1e-4), (out, ref)

    print("KERNEL_OK")
</pallas_src>

<mosaic_0001>
module attributes {stable_mosaic.version = 11 : i64} {
  func.func @critic_kernel(%arg0: memref<8x32xf32, #tpu.memory_space<vmem>>, %arg1: memref<32x512xbf16, #tpu.memory_space<vmem>>, %arg2: memref<2x512xf32, #tpu.memory_space<vmem>>, %arg3: memref<2x384xf32, #tpu.memory_space<vmem>>, %arg4: memref<1x1xf32, #tpu.memory_space<smem>>, %arg5: memref<512x384xbf16, #tpu.memory_space<any>>, %arg6: memref<8x1xf32, #tpu.memory_space<vmem>>, %arg7: memref<512x384xbf16, #tpu.memory_space<vmem>>, %arg8: memref<!tpu.dma_semaphore, #tpu.memory_space<semaphore_mem>>) attributes {dimension_semantics = [], scalar_prefetch = 0 : i64, scratch_operands = 2 : i64, tpu.core_type = #tpu.core_type<tc>} {
    tpu.enqueue_dma source(%arg5 : memref<512x384xbf16, #tpu.memory_space<any>>) target(%arg7 : memref<512x384xbf16, #tpu.memory_space<vmem>>) target_semaphore(%arg8 : memref<!tpu.dma_semaphore, #tpu.memory_space<semaphore_mem>>)
    %c0 = arith.constant 0 : index
    %c0_0 = arith.constant 0 : index
    %0 = vector.load %arg0[%c0, %c0_0] : memref<8x32xf32, #tpu.memory_space<vmem>>, vector<8x32xf32>
    %1 = arith.truncf %0 : vector<8x32xf32> to vector<8x32xbf16>
    %c0_1 = arith.constant 0 : index
    %c0_2 = arith.constant 0 : index
    %2 = vector.load %arg1[%c0_1, %c0_2] : memref<32x512xbf16, #tpu.memory_space<vmem>>, vector<32x512xbf16>
    %cst = arith.constant dense<0.000000e+00> : vector<8x512xf32>
    %3 = tpu.matmul %1, %2, %cst {dimension_numbers = #tpu.dot_dimension_numbers<[1], [0], [0], [1], [0, 0, 1, 1], [], []>} : vector<8x32xbf16>, vector<32x512xbf16>, vector<8x512xf32> -> vector<8x512xf32>
    %cst_3 = arith.constant dense<0.000000e+00> : vector<512xf32>
    %4 = vector.multi_reduction <add>, %3, %cst_3 [0] : vector<8x512xf32> to vector<512xf32>
    %5 = vector.shape_cast %4 : vector<512xf32> to vector<1x512xf32>
    %6 = arith.mulf %3, %3 : vector<8x512xf32>
    %cst_4 = arith.constant dense<0.000000e+00> : vector<512xf32>
    %7 = vector.multi_reduction <add>, %6, %cst_4 [0] : vector<8x512xf32> to vector<512xf32>
    %8 = vector.shape_cast %7 : vector<512xf32> to vector<1x512xf32>
    %cst_5 = arith.constant 1.250000e-01 : f32
    %9 = vector.broadcast %cst_5 : f32 to vector<1x512xf32>
    %10 = arith.mulf %5, %9 : vector<1x512xf32>
    %cst_6 = arith.constant 1.250000e-01 : f32
    %11 = vector.broadcast %cst_6 : f32 to vector<1x512xf32>
    %12 = arith.mulf %8, %11 : vector<1x512xf32>
    %13 = arith.mulf %10, %10 : vector<1x512xf32>
    %14 = arith.subf %12, %13 : vector<1x512xf32>
    %c0_7 = arith.constant 0 : index
    %c0_8 = arith.constant 0 : index
    %15 = vector.load %arg2[%c0_7, %c0_8] : memref<2x512xf32, #tpu.memory_space<vmem>>, vector<2x512xf32>
    %16 = vector.extract_strided_slice %15 {offsets = [0, 0], sizes = [1, 512], strides = [1, 1]} : vector<2x512xf32> to vector<1x512xf32>
    %cst_9 = arith.constant 9.99999974E-6 : f32
    %17 = vector.broadcast %cst_9 : f32 to vector<1x512xf32>
    %18 = arith.addf %14, %17 : vector<1x512xf32>
    %19 = math.rsqrt %18 : vector<1x512xf32>
    %20 = arith.mulf %16, %19 : vector<1x512xf32>
    %21 = vector.extract_strided_slice %15 {offsets = [1, 0], sizes = [1, 512], strides = [1, 1]} : vector<2x512xf32> to vector<1x512xf32>
    %22 = arith.mulf %10, %20 : vector<1x512xf32>
    %23 = arith.subf %21, %22 : vector<1x512xf32>
    %24 = vector.broadcast %20 : vector<1x512xf32> to vector<8x512xf32>
    %25 = arith.mulf %3, %24 : vector<8x512xf32>
    %26 = vector.broadcast %23 : vector<1x512xf32> to vector<8x512xf32>
    %27 = arith.addf %25, %26 : vector<8x512xf32>
    %cst_10 = arith.constant 0.000000e+00 : f32
    %28 = vector.broadcast %cst_10 : f32 to vector<8x512xf32>
    %29 = arith.maximumf %27, %28 : vector<8x512xf32>
    tpu.wait_dma2 semaphore(%arg8 : memref<!tpu.dma_semaphore, #tpu.memory_space<semaphore_mem>>) src(%arg5 : memref<512x384xbf16, #tpu.memory_space<any>>) dst(%arg7 : memref<512x384xbf16, #tpu.memory_space<vmem>>)
    %c0_11 = arith.constant 0 : index
    %c0_12 = arith.constant 0 : index
    %30 = vector.load %arg3[%c0_11, %c0_12] : memref<2x384xf32, #tpu.memory_space<vmem>>, vector<2x384xf32>
    %31 = arith.truncf %29 : vector<8x512xf32> to vector<8x512xbf16>
    %c0_13 = arith.constant 0 : index
    %c0_14 = arith.constant 0 : index
    %32 = vector.load %arg7[%c0_13, %c0_14] : memref<512x384xbf16, #tpu.memory_space<vmem>>, vector<512x384xbf16>
    %cst_15 = arith.constant dense<0.000000e+00> : vector<8x384xf32>
    %33 = tpu.matmul %31, %32, %cst_15 {dimension_numbers = #tpu.dot_dimension_numbers<[1], [0], [0], [1], [0, 0, 1, 1], [], []>} : vector<8x512xbf16>, vector<512x384xbf16>, vector<8x384xf32> -> vector<8x384xf32>
    %34 = vector.extract_strided_slice %30 {offsets = [0, 0], sizes = [1, 384], strides = [1, 1]} : vector<2x384xf32> to vector<1x384xf32>
    %35 = vector.broadcast %34 : vector<1x384xf32> to vector<8x384xf32>
    %36 = arith.addf %33, %35 : vector<8x384xf32>
    %cst_16 = arith.constant 0.000000e+00 : f32
    %37 = vector.broadcast %cst_16 : f32 to vector<8x384xf32>
    %38 = arith.maximumf %36, %37 : vector<8x384xf32>
    %39 = vector.extract_strided_slice %30 {offsets = [1, 0], sizes = [1, 384], strides = [1, 1]} : vector<2x384xf32> to vector<1x384xf32>
    %40 = vector.broadcast %39 : vector<1x384xf32> to vector<8x384xf32>
    %41 = arith.mulf %38, %40 : vector<8x384xf32>
    %cst_17 = arith.constant dense<0.000000e+00> : vector<8xf32>
    %42 = vector.multi_reduction <add>, %41, %cst_17 [1] : vector<8x384xf32> to vector<8xf32>
    %43 = vector.shape_cast %42 : vector<8xf32> to vector<8x1xf32>
    %c0_18 = arith.constant 0 : index
    %c0_19 = arith.constant 0 : index
    %44 = memref.load %arg4[%c0_18, %c0_19] : memref<1x1xf32, #tpu.memory_space<smem>>
    %45 = vector.broadcast %44 : f32 to vector<8x1xf32>
    %46 = arith.addf %43, %45 : vector<8x1xf32>
    %c0_20 = arith.constant 0 : index
    %c0_21 = arith.constant 0 : index
    %47 = vector.load %arg6[%c0_20, %c0_21] : memref<8x1xf32, #tpu.memory_space<vmem>>, vector<8x1xf32>
    tpu.vector_store %arg6[%c0_20, %c0_21], %46 {strides = array<i32>} : memref<8x1xf32, #tpu.memory_space<vmem>>, vector<8x1xf32>,
    return
  }
}

</mosaic_0001>

<bundles_post_ra>
// kernel: tpu_custom_call.1
= control target key start
LH: loop header
LB: loop body
LE: loop exit
PB: predicated region body
PF: predicated region fallthrough
CT: control target
= control target key end

     0   :  { %12 = vsyncpa [#allocation6], 0  ;;  %s2063_s0 = inlined_call_operand.hbm [shape: f32[8,32], index: 0, kind: input, shape index: {}]   ;;  %s2064_s1 = inlined_call_operand.hbm [shape: bf16[32,512], index: 1, kind: input, shape index: {}]   ;;  %s2065_s2 = inlined_call_operand.hbm [shape: f32[2,512], index: 2, kind: input, shape index: {}]   ;;  %s2066_s3 = inlined_call_operand.hbm [shape: f32[2,384], index: 3, kind: input, shape index: {}]   ;;  %s2067_s4 = inlined_call_operand.<no memory space> [shape: f32[1,1], index: 4, kind: input, shape index: {}]   ;;  %s2068_s5 = inlined_call_operand.hbm [shape: bf16[512,384], index: 5, kind: input, shape index: {}]   ;;  %s2069_s6 = inlined_call_operand.vmem [shape: f32[8,1], index: 6, kind: output, shape index: {}]  }
   0x1   :  { %13 = vsyncpa [#allocation8], 0  ;;  %s30_s23 = sshll.u32 %s2064_s1, 4  ;;  %s31_s23 = int_to_ptr.hbm [resolvable:$true] %s30_s23 }
   0x2   :  { %14 = vsyncpa [#allocation11], 0  ;;  %s1902_s24 = smov [#allocation7]   ;;  %s20_s28 = sshll.u32 %s2063_s0, 4  ;;  %s21_s28 = int_to_ptr.hbm [resolvable:$true] %s20_s28 }
   0x3   :  { %s32_s25 = sshll.u32 %s1902_s24, 4  ;;  %s1903_s29 = smov 256   ;;  %s33_s25 = int_to_ptr.vmem [resolvable:$true] %s32_s25 }
   0x4   :  { %s1904_s30 = smov 16   ;;  %s1905_s7 = smov [#allocation5]  }
   0x5   :  { %38 = dma.hbm_to_vmem [thread:$0]  %s31_s23, 1024, %s33_s25, [#allocation8], %s1903_s29, %s1903_s29, %s1904_s30  }
   0x6   :  { %s22_s8 = sshll.u32 %s1905_s7, 4  ;;  %s44_s11 = sshll.u32 %s2065_s2, 4  ;;  %s23_s8 = int_to_ptr.vmem [resolvable:$true] %s22_s8  ;;  %s45_s11 = int_to_ptr.hbm [resolvable:$true] %s44_s11 }
   0x7   :  { %25 = dma.hbm_to_vmem [thread:$0]  %s21_s28, 128, %s23_s8, [#allocation6]  }
   0x8   :  { %s55_s13 = sshll.u32 %s2066_s3, 4  ;;  %s1906_s14 = smov [#allocation9]   ;;  %s56_s13 = int_to_ptr.hbm [resolvable:$true] %s55_s13 }
   0x9   :  { %s46_s15 = sshll.u32 %s1906_s14, 4  ;;  %s1907_s0 = smov [#allocation10]   ;;  %s47_s15 = int_to_ptr.vmem [resolvable:$true] %s46_s15 }
   0xa   :  { %49 = dma.hbm_to_vmem [thread:$0]  %s45_s11, 128, %s47_s15, [#allocation8]  }
   0xb   :  { %s57_s16 = sshll.u32 %s1907_s0, 4  ;;  %s58_s16 = int_to_ptr.vmem [resolvable:$true] %s57_s16 }
   0xc   :  { %60 = dma.hbm_to_vmem [thread:$0]  %s56_s13, 96, %s58_s16, [#allocation11]  }
   0xd   :  { %1894 = dma.done.wait [#allocation6], 128  }
   0xe   :  { %1895 = vsyncadd [#allocation6], 4294967168 }
   0xf   :  { %1896 = dma.done.wait [#allocation8], 1152  }
  0x10   :  { %1897 = vsyncadd [#allocation8], 4294966144 }
  0x11   :  { %1898 = dma.done.wait [#allocation11], 96  }
  0x12   :  { %1899 = vsyncadd [#allocation11], 4294967200  ;;  %v1252_v0 = vld [vmem:[#allocation7 + $0x20] sm:$0xf]  ;;  %v1661_v1 = vld [vmem:[#allocation7 + $0x2c] sm:$0xf0] }
  0x13   :  { %v1659_v2 = vld [vmem:[#allocation7 + $0x24] sm:$0xf]  ;;  %v1253_v3 = vor.u32 %v1661_v1, %v1252_v0  ;;  %v1254_v4 = vld [vmem:[#allocation7 + $0x30] sm:$0xf0]  ;;  %v1260_v5 = vld [vmem:[#allocation7 + $0x28] sm:$0xf] }
  0x14   :  { %v1662_v6 = vld [vmem:[#allocation7 + $0x34] sm:$0xf0]  ;;  %v1257_v7 = vor.u32 %v1659_v2, %v1254_v4  ;;  %v1660_v9 = vld [vmem:[#allocation7 + $0x2c] sm:$0xf]  ;;  %v1262_v10 = vld [vmem:[#allocation7 + $0x38] sm:$0xf0] }
  0x15   :  { %v1261_v8 = vor.u32 %v1662_v6, %v1260_v5  ;;  %v1236_v11 = vld [vmem:[#allocation7] sm:$0xf]  ;;  %153 = vmatpush.bf16.msra.mxu0 %v1253_v3  ;;  %v1265_v12 = vor.u32 %v1660_v9, %v1262_v10  ;;  %v1657_v13 = vld [vmem:[#allocation7 + $0xc] sm:$0xf0]  ;;  %v1655_v14 = vld [vmem:[#allocation7 + $0x4] sm:$0xf] }
  0x16   :  { %v1238_v15 = vld [vmem:[#allocation7 + $0x10] sm:$0xf0]  ;;  %166 = vmatpush.bf16.msra.mxu1 %v1257_v7  ;;  %v1237_v16 = vor.u32 %v1657_v13, %v1236_v11  ;;  %v1244_v18 = vld [vmem:[#allocation7 + $0x8] sm:$0xf]  ;;  %v1658_v19 = vld [vmem:[#allocation7 + $0x14] sm:$0xf0] }
  0x17   :  { %179 = vmatpush.bf16.msra.mxu2 %v1261_v8  ;;  %v1241_v17 = vor.u32 %v1655_v14, %v1238_v15  ;;  %v1656_v20 = vld [vmem:[#allocation7 + $0xc] sm:$0xf]  ;;  %192 = vmatpush.bf16.msra.mxu3 %v1265_v12  ;;  %v1245_v21 = vor.u32 %v1658_v19, %v1244_v18  ;;  %v1246_v22 = vld [vmem:[#allocation7 + $0x18] sm:$0xf0]  ;;  %vm143_vm0 = vcmask 261120   ;;  %s87_s17 = sshll.u32 %s2068_s5, 4  ;;  %s88_s17 = int_to_ptr.hbm [resolvable:$true] %s87_s17 }
  0x18   :  { %v93_v23 = vld [vmem:[#allocation5] sm:$0xff]  ;;  %v1249_v24 = vor.u32 %v1656_v20, %v1246_v22  ;;  %s1908_s18 = smov [#allocation2]   ;;  %vm319_vm11 = vcmask 1041408   ;;  %vm321_vm13 = vcmask 1045508   ;;  %vm323_vm15 = vcmask 1043456  }
  0x19   :  { %v94_v25 = vpack.c.bf16 %v93_v23, %v93_v23  ;;  %154 = vmatpush.bf16.msra.mxu0 %v1237_v16  ;;  %s89_s19 = sshll.u32 %s1908_s18, 4  ;;  %s90_s19 = int_to_ptr.vmem [resolvable:$true] %s89_s19 }
  0x1a   :  { %167 = vmatpush.bf16.msra.mxu1 %v1241_v17  ;;  %92 = dma.hbm_to_vmem [thread:$0]  %s88_s17, 12288, %s90_s19, [#allocation3] }
  0x1b   :  { %180 = vmatpush.bf16.msra.mxu2 %v1245_v21  ;;  %193 = vmatpush.bf16.msra.mxu3 %v1249_v24 }
  0x1c   :  { %1266 = vmatmul.msk.bf16.vlgmr.msra.gmra.mxu0 %vm143_vm0, %v94_v25 }
  0x1d   :  { %1267 = vmatmul.msk.bf16.vlgmr.msra.gmra.mxu1 %vm143_vm0, %v94_v25 }
  0x1e   :  { %1268 = vmatmul.msk.bf16.vlgmr.msra.gmra.mxu2 %vm143_vm0, %v94_v25  ;;  %1269 = vmatmul.msk.bf16.vlgmr.msra.gmra.mxu3 %vm143_vm0, %v94_v25 }
  0x99   :  { %v1959_v26 = vpop.f32.mrf.mxu0 }
  0x9a   :  { %v199_v27 = vrot.slane %v1959_v26, 4  ;;  %v223_v28 = vmul.f32 %v1959_v26, %v1959_v26  ;;  %v1964_v29 = vpop.f32.mrf.mxu1 }
  0x9b   :  { %v205_v30 = vrot.slane %v1964_v29, 4  ;;  %v224_v31 = vmul.f32 %v1964_v29, %v1964_v29 }
  0x9c   :  { %v200_v32 = vadd.f32 %v199_v27, %v1959_v26  ;;  %v227_v33 = vrot.slane %v223_v28, 4 }
  0x9d   :  { %v206_v34 = vadd.f32 %v205_v30, %v1964_v29  ;;  %v233_v35 = vrot.slane %v224_v31, 4 }
  0x9e   :  { %v201_v36 = vrot.slane %v200_v32, 2  ;;  %v228_v37 = vadd.f32 %v227_v33, %v223_v28 }
  0x9f   :  { %v207_v38 = vrot.slane %v206_v34, 2  ;;  %v234_v39 = vadd.f32 %v233_v35, %v224_v31 }
  0xa0   :  { %v202_v40 = vadd.f32 %v201_v36, %v200_v32  ;;  %v229_v41 = vrot.slane %v228_v37, 2 }
  0xa1   :  { %v1971_v42 = vpop.f32.mrf.mxu2  ;;  %v208_v43 = vadd.f32 %v207_v38, %v206_v34  ;;  %v235_v44 = vrot.slane %v234_v39, 2  ;;  %v1976_v47 = vpop.f32.mrf.mxu3 }
  0xa2   :  { %v211_v45 = vrot.slane %v1971_v42, 4  ;;  %v225_v46 = vmul.f32 %v1971_v42, %v1971_v42  ;;  %v158_v48 = vpop.f32.mrf.mxu0  ;;  %v203_v49 = vrot.slane %v202_v40, 1  ;;  %v230_v50 = vadd.f32 %v229_v41, %v228_v37  ;;  %v171_v53 = vpop.f32.mrf.mxu1 }
  0xa3   :  { %v217_v51 = vrot.slane %v1976_v47, 4  ;;  %v226_v52 = vmul.f32 %v1976_v47, %v1976_v47  ;;  %v209_v54 = vrot.slane %v208_v43, 1  ;;  %v236_v55 = vadd.f32 %v235_v44, %v234_v39 }
  0xa4   :  { %v212_v56 = vadd.f32 %v211_v45, %v1971_v42  ;;  %v239_v57 = vrot.slane %v225_v46, 4  ;;  %v204_v58 = vadd.f32 %v203_v49, %v202_v40  ;;  %v231_v59 = vrot.slane %v230_v50, 1 }
  0xa5   :  { %v218_v60 = vadd.f32 %v217_v51, %v1976_v47  ;;  %v245_v61 = vrot.slane %v226_v52, 4  ;;  %v210_v62 = vadd.f32 %v209_v54, %v208_v43  ;;  %v237_v63 = vrot.slane %v236_v55, 1 }
  0xa6   :  { %v213_v0 = vrot.slane %v212_v56, 2  ;;  %v240_v1 = vadd.f32 %v239_v57, %v225_v46  ;;  %v232_v2 = vadd.f32 %v231_v59, %v230_v50  ;;  %v1983_v3 = vmul.f32 0.125, %v204_v58 }
  0xa7   :  { %v219_v4 = vrot.slane %v218_v60, 2  ;;  %v246_v5 = vadd.f32 %v245_v61, %v226_v52  ;;  %v238_v6 = vadd.f32 %v237_v63, %v236_v55  ;;  %v1985_v7 = vmul.f32 0.125, %v210_v62 }
  0xa8   :  { %v214_v8 = vadd.f32 %v213_v0, %v212_v56  ;;  %v241_v9 = vrot.slane %v240_v1, 2  ;;  %v255_v10 = vmul.f32 0.125, %v232_v2  ;;  %v259_v11 = vmul.f32 %v1983_v3, %v1983_v3 }
  0xa9   :  { %v220_v12 = vadd.f32 %v219_v4, %v218_v60  ;;  %v247_v13 = vrot.slane %v246_v5, 2  ;;  %v184_v14 = vpop.f32.mrf.mxu2  ;;  %v256_v15 = vmul.f32 0.125, %v238_v6  ;;  %v260_v16 = vmul.f32 %v1985_v7, %v1985_v7  ;;  %v197_v19 = vpop.f32.mrf.mxu3 }
  0xaa   :  { %v215_v17 = vrot.slane %v214_v8, 1  ;;  %v242_v18 = vadd.f32 %v241_v9, %v240_v1  ;;  %v263_v20 = vsub.f32 %v255_v10, %v259_v11 }
  0xab   :  { %v221_v21 = vrot.slane %v220_v12, 1  ;;  %v248_v22 = vadd.f32 %v247_v13, %v246_v5  ;;  %v264_v23 = vsub.f32 %v256_v15, %v260_v16  ;;  %v267_v15 = vld [vmem:[#allocation9] sm:$0xff] }
  0xac   :  { %v216_v24 = vadd.f32 %v215_v17, %v214_v8  ;;  %v243_v25 = vrot.slane %v242_v18, 1  ;;  %v268_v27 = vadd.f32 1e-05, %v263_v20 }
  0xad   :  { %v222_v28 = vadd.f32 %v221_v21, %v220_v12  ;;  %v249_v30 = vrot.slane %v248_v22, 1  ;;  %v269_v31 = vadd.f32 1e-05, %v264_v23 }
  0xae   :  { %v244_v32 = vadd.f32 %v243_v25, %v242_v18  ;;  %v1991_v33 = vmul.f32 0.125, %v216_v24  ;;  %1766 = vrsqrt.f32 %v268_v27  ;;  %vm278_vm12 = vweird.f32 %v268_v27 }
  0xaf   :  { %v250_v34 = vadd.f32 %v249_v30, %v248_v22  ;;  %v1993_v35 = vmul.f32 0.125, %v222_v28  ;;  %1768 = vrsqrt.f32 %v269_v31  ;;  %vm288_vm2 = vweird.f32 %v269_v31 }
  0xb0   :  { %v257_v36 = vmul.f32 0.125, %v244_v32  ;;  %v261_v37 = vmul.f32 %v1991_v33, %v1991_v33 }
  0xb1   :  { %v258_v38 = vmul.f32 0.125, %v250_v34  ;;  %v262_v39 = vmul.f32 %v1993_v35, %v1993_v35 }
  0xb2   :  { %v265_v40 = vsub.f32 %v257_v36, %v261_v37 }
  0xb3   :  { %v266_v41 = vsub.f32 %v258_v38, %v262_v39 }
  0xb4   :  { %v270_v43 = vadd.f32 1e-05, %v265_v40  ;;  %v1767_v44 = vpop.eup %1766 }
  0xb5   :  { %v271_v45 = vadd.f32 1e-05, %v266_v41  ;;  %v1769_v46 = vpop.eup %1768  ;;  %v273_v48 = vmul.f32 %v1767_v44, %v268_v27  ;;  %vm279_vm7 = vweird.f32 %v1767_v44 }
  0xb6   :  { %1770 = vrsqrt.f32 %v270_v43  ;;  %v283_v49 = vmul.f32 %v1769_v46, %v269_v31  ;;  %vm289_vm1 = vweird.f32 %v1769_v46  ;;  %vm298_vm6 = vweird.f32 %v270_v43  ;;  %vm280_vm14 = vmor %vm278_vm12, %vm279_vm7 }
  0xb7   :  { %1772 = vrsqrt.f32 %v271_v45  ;;  %v274_v51 = vmul.f32 %v1767_v44, %v273_v48  ;;  %vm290_vm3 = vmor %vm288_vm2, %vm289_vm1  ;;  %vm308_vm9 = vweird.f32 %v271_v45 }
  0xb8   :  { %v284_v50 = vmul.f32 %v1769_v46, %v283_v49 }
  0xb9   :  { %v275_v57 = vmul.f32 0.5, %v274_v51 }
  0xba   :  { %v285_v52 = vmul.f32 0.5, %v284_v50 }
  0xbb   :  { %v276_v63 = vsub.f32 1.5, %v275_v57 }
  0xbc   :  { %v1771_v53 = vpop.eup %1770  ;;  %v286_v55 = vsub.f32 1.5, %v285_v52 }
  0xbd   :  { %v1773_v54 = vpop.eup %1772  ;;  %v293_v56 = vmul.f32 %v1771_v53, %v270_v43  ;;  %vm299_vm4 = vweird.f32 %v1771_v53  ;;  %v277_v6 = vmul.f32 %v1767_v44, %v276_v63 }
  0xbe   :  { %v303_v58 = vmul.f32 %v1773_v54, %v271_v45  ;;  %v287_v60 = vmul.f32 %v1769_v46, %v286_v55  ;;  %vm309_vm5 = vweird.f32 %v1773_v54  ;;  %vm300_vm8 = vmor %vm298_vm6, %vm299_vm4 }
  0xbf   :  { %v294_v59 = vmul.f32 %v1771_v53, %v293_v56  ;;  %vm310_vm10 = vmor %vm308_vm9, %vm309_vm5  ;;  %v281_v14 = vsel %vm280_vm14, %v1767_v44, %v277_v6 }
  0xc0   :  { %v304_v61 = vmul.f32 %v1773_v54, %v303_v58  ;;  %v291_v2 = vsel %vm290_vm3, %v1769_v46, %v287_v60 }
  0xc1   :  { %v295_v62 = vmul.f32 0.5, %v294_v59  ;;  %v316_v9 = vrot.slane %v291_v2, 6 }
  0xc2   :  { %v305_v0 = vmul.f32 0.5, %v304_v61 }
  0xc3   :  { %v296_v1 = vsub.f32 1.5, %v295_v62  ;;  %v320_v16 = vsel %vm319_vm11, %v281_v14, %v316_v9 }
  0xc4   :  { %v306_v4 = vsub.f32 1.5, %v305_v0 }
  0xc5   :  { %v297_v5 = vmul.f32 %v1771_v53, %v296_v1 }
  0xc6   :  { %v307_v8 = vmul.f32 %v1773_v54, %v306_v4 }
  0xc7   :  { %v301_v10 = vsel %vm300_vm8, %v1771_v53, %v297_v5 }
  0xc8   :  { %v317_v11 = vrot.slane %v301_v10, 4  ;;  %v311_v12 = vsel %vm310_vm10, %v1773_v54, %v307_v8 }
  0xc9   :  { %v318_v13 = vrot.slane %v311_v12, 2 }
  0xcb   :  { %v322_v17 = vsel %vm321_vm13, %v317_v11, %v318_v13 }
  0xcc   :  { %v324_v18 = vsel %vm323_vm15, %v320_v16, %v322_v17 }
  0xcd   :  { %v326_v19 = vmul.f32 %v324_v18, %v267_v15 }
  0xcf   :  { %v328_v20 = vperm.slane %v326_v19, 0  ;;  %v329_v21 = vperm.slane %v326_v19, 2  ;;  %v330_v22 = vperm.slane %v326_v19, 4  ;;  %v331_v23 = vperm.slane %v326_v19, 6 }
  0xd1   :  { %v337_v24 = vmul.f32 %v329_v21, %v1985_v7  ;;  %v338_v25 = vmul.f32 %v330_v22, %v1991_v33  ;;  %v339_v27 = vmul.f32 %v331_v23, %v1993_v35  ;;  %v336_v28 = vmul.f32 %v328_v20, %v1983_v3 }
  0xd2   :  { %v353_v39 = vperm.slane %v328_v20, 0  ;;  %v354_v40 = vperm.slane %v329_v21, 0  ;;  %v355_v41 = vperm.slane %v330_v22, 0  ;;  %v356_v7 = vperm.slane %v331_v23, 0 }
  0xd3   :  { %v344_v30 = vrot.slane %v337_v24, 6  ;;  %v345_v31 = vrot.slane %v338_v25, 4  ;;  %v346_v32 = vrot.slane %v339_v27, 2 }
  0xd4   :  { %v357_v3 = vmul.f32 %v353_v39, %v1959_v26  ;;  %v358_v46 = vmul.f32 %v354_v40, %v1964_v29  ;;  %v359_v48 = vmul.f32 %v355_v41, %v1971_v42  ;;  %v360_v49 = vmul.f32 %v356_v7, %v1976_v47 }
  0xd5   :  { %v347_v34 = vsel %vm319_vm11, %v336_v28, %v344_v30  ;;  %v348_v36 = vsel %vm321_vm13, %v345_v31, %v346_v32 }
  0xd6   :  { %v349_v37 = vsel %vm323_vm15, %v347_v34, %v348_v36 }
  0xd7   :  { %v350_v38 = vrot.slane %v349_v37, 7 }
  0xd9   :  { %v352_v43 = vsub.f32 %v267_v15, %v350_v38 }
  0xdb   :  { %v362_v33 = vperm.slane %v352_v43, 1  ;;  %v363_v44 = vperm.slane %v352_v43, 3  ;;  %v364_v35 = vperm.slane %v352_v43, 5  ;;  %v365_v45 = vperm.slane %v352_v43, 7 }
  0xdd   :  { %v370_v50 = vperm.slane %v362_v33, 1  ;;  %v371_v51 = vperm.slane %v363_v44, 1  ;;  %v372_v52 = vperm.slane %v364_v35, 1  ;;  %v373_v53 = vperm.slane %v365_v45, 1 }
  0xdf   :  { %v2013_v54 = vadd.f32 %v370_v50, %v357_v3  ;;  %v2015_v55 = vadd.f32 %v371_v51, %v358_v46  ;;  %v2017_v56 = vadd.f32 %v372_v52, %v359_v48  ;;  %v2019_v57 = vadd.f32 %v373_v53, %v360_v49 }
  0xe1   :  { %v378_v26 = vmax.f32 %v2013_v54, 0.0  ;;  %v379_v29 = vmax.f32 %v2015_v55, 0.0  ;;  %v380_v42 = vmax.f32 %v2017_v56, 0.0  ;;  %v381_v47 = vmax.f32 %v2019_v57, 0.0 }
  0xe2   :  { %1900 = dma.done.wait [#allocation3], 12288 }
  0xe3   :  { %1901 = vsyncadd [#allocation3], 4294955008  ;;  %v1356_v58 = vld [vmem:[#allocation2 + $0xa8] sm:$0xf]  ;;  %v1685_v59 = vld [vmem:[#allocation2 + $0xb0] sm:$0xf0] }
  0xe4   :  { %v1452_v60 = vld [vmem:[#allocation2 + $0x168] sm:$0xf]  ;;  %v1357_v61 = vor.u32 %v1685_v59, %v1356_v58  ;;  %v1709_v62 = vld [vmem:[#allocation2 + $0x170] sm:$0xf0]  ;;  %v1344_v6 = vld [vmem:[#allocation2 + $0x90] sm:$0xf] }
  0xe5   :  { %v1548_v63 = vld [vmem:[#allocation2 + $0x228] sm:$0xf]  ;;  %v1733_v0 = vld [vmem:[#allocation2 + $0x230] sm:$0xf0]  ;;  %v1453_v1 = vor.u32 %v1709_v62, %v1452_v60  ;;  %v1682_v9 = vld [vmem:[#allocation2 + $0x98] sm:$0xf0] }
  0xe6   :  { %v1549_v2 = vor.u32 %v1733_v0, %v1548_v63  ;;  %v1644_v4 = vld [vmem:[#allocation2 + $0x2e8] sm:$0xf]  ;;  %v1757_v5 = vld [vmem:[#allocation2 + $0x2f0] sm:$0xf0]  ;;  %1041 = vmatpush.bf16.msrb.mxu0 %v1357_v61  ;;  %v1440_v10 = vld [vmem:[#allocation2 + $0x150] sm:$0xf]  ;;  %v1345_v12 = vor.u32 %v1682_v9, %v1344_v6 }
  0xe7   :  { %v1645_v8 = vor.u32 %v1757_v5, %v1644_v4  ;;  %v1706_v11 = vld [vmem:[#allocation2 + $0x158] sm:$0xf0]  ;;  %1054 = vmatpush.bf16.msrb.mxu1 %v1453_v1  ;;  %v1536_v14 = vld [vmem:[#allocation2 + $0x210] sm:$0xf]  ;;  %v1332_v19 = vld [vmem:[#allocation2 + $0x78] sm:$0xf] }
  0xe8   :  { %1067 = vmatpush.bf16.msrb.mxu2 %v1549_v2  ;;  %v1441_v13 = vor.u32 %v1706_v11, %v1440_v10  ;;  %v1730_v15 = vld [vmem:[#allocation2 + $0x218] sm:$0xf0]  ;;  %v1632_v16 = vld [vmem:[#allocation2 + $0x2d0] sm:$0xf]  ;;  %v1679_v20 = vld [vmem:[#allocation2 + $0x80] sm:$0xf0] }
  0xe9   :  { %1080 = vmatpush.bf16.msrb.mxu3 %v1645_v8  ;;  %v1537_v17 = vor.u32 %v1730_v15, %v1536_v14  ;;  %v1754_v18 = vld [vmem:[#allocation2 + $0x2d8] sm:$0xf0]  ;;  %v1428_v22 = vld [vmem:[#allocation2 + $0x138] sm:$0xf]  ;;  %v1703_v23 = vld [vmem:[#allocation2 + $0x140] sm:$0xf0]  ;;  %v1333_v25 = vor.u32 %v1679_v20, %v1332_v19 }
  0xea   :  { %v1633_v21 = vor.u32 %v1754_v18, %v1632_v16  ;;  %v1524_v24 = vld [vmem:[#allocation2 + $0x1f8] sm:$0xf]  ;;  %1042 = vmatpush.bf16.msrb.mxu0 %v1345_v12  ;;  %v1727_v27 = vld [vmem:[#allocation2 + $0x200] sm:$0xf0]  ;;  %v1429_v31 = vor.u32 %v1703_v23, %v1428_v22  ;;  %v1320_v34 = vld [vmem:[#allocation2 + $0x60] sm:$0xf] }
  0xeb   :  { %v1620_v28 = vld [vmem:[#allocation2 + $0x2b8] sm:$0xf]  ;;  %v1751_v30 = vld [vmem:[#allocation2 + $0x2c0] sm:$0xf0]  ;;  %1055 = vmatpush.bf16.msrb.mxu1 %v1441_v13  ;;  %v1525_v32 = vor.u32 %v1727_v27, %v1524_v24  ;;  %v1676_v36 = vld [vmem:[#allocation2 + $0x68] sm:$0xf0] }
  0xec   :  { %1068 = vmatpush.bf16.msrb.mxu2 %v1537_v17  ;;  %v1416_v37 = vld [vmem:[#allocation2 + $0x120] sm:$0xf]  ;;  %v1621_v38 = vor.u32 %v1751_v30, %v1620_v28  ;;  %v1700_v39 = vld [vmem:[#allocation2 + $0x128] sm:$0xf0]  ;;  %v1321_v33 = vor.u32 %v1676_v36, %v1320_v34  ;;  %v1308_v45 = vld [vmem:[#allocation2 + $0x48] sm:$0xf] }
  0xed   :  { %1081 = vmatpush.bf16.msrb.mxu3 %v1633_v21  ;;  %v1512_v40 = vld [vmem:[#allocation2 + $0x1e0] sm:$0xf]  ;;  %v1724_v41 = vld [vmem:[#allocation2 + $0x1e8] sm:$0xf0]  ;;  %v1417_v44 = vor.u32 %v1700_v39, %v1416_v37  ;;  %v1673_v3 = vld [vmem:[#allocation2 + $0x50] sm:$0xf0] }
  0xee   :  { %v1608_v7 = vld [vmem:[#allocation2 + $0x2a0] sm:$0xf]  ;;  %v1748_v43 = vld [vmem:[#allocation2 + $0x2a8] sm:$0xf0]  ;;  %1043 = vmatpush.bf16.msrb.mxu0 %v1333_v25  ;;  %v1513_v35 = vor.u32 %v1724_v41, %v1512_v40  ;;  %v1404_v46 = vld [vmem:[#allocation2 + $0x108] sm:$0xf]  ;;  %v1309_v58 = vor.u32 %v1673_v3, %v1308_v45 }
  0xef   :  { %1056 = vmatpush.bf16.msrb.mxu1 %v1429_v31  ;;  %v1609_v48 = vor.u32 %v1748_v43, %v1608_v7  ;;  %v1697_v49 = vld [vmem:[#allocation2 + $0x110] sm:$0xf0]  ;;  %v1500_v50 = vld [vmem:[#allocation2 + $0x1c8] sm:$0xf]  ;;  %v1296_v61 = vld [vmem:[#allocation2 + $0x30] sm:$0xf] }
  0xf0   :  { %1069 = vmatpush.bf16.msrb.mxu2 %v1525_v32  ;;  %v1721_v51 = vld [vmem:[#allocation2 + $0x1d0] sm:$0xf0]  ;;  %v1596_v52 = vld [vmem:[#allocation2 + $0x288] sm:$0xf]  ;;  %v1405_v59 = vor.u32 %v1697_v49, %v1404_v46  ;;  %v1670_v62 = vld [vmem:[#allocation2 + $0x38] sm:$0xf0] }
  0xf1   :  { %1082 = vmatpush.bf16.msrb.mxu3 %v1621_v38  ;;  %v1745_v53 = vld [vmem:[#allocation2 + $0x290] sm:$0xf0]  ;;  %v1501_v60 = vor.u32 %v1721_v51, %v1500_v50  ;;  %v1392_v63 = vld [vmem:[#allocation2 + $0xf0] sm:$0xf]  ;;  %v1694_v1 = vld [vmem:[#allocation2 + $0xf8] sm:$0xf0]  ;;  %v1297_v8 = vor.u32 %v1670_v62, %v1296_v61 }
  0xf2   :  { %1044 = vmatpush.bf16.msrb.mxu0 %v1321_v33  ;;  %v1597_v0 = vor.u32 %v1745_v53, %v1596_v52  ;;  %v1488_v2 = vld [vmem:[#allocation2 + $0x1b0] sm:$0xf]  ;;  %v1718_v4 = vld [vmem:[#allocation2 + $0x1b8] sm:$0xf0]  ;;  %v1393_v9 = vor.u32 %v1694_v1, %v1392_v63  ;;  %v1284_v11 = vld [vmem:[#allocation2 + $0x18] sm:$0xf]  ;;  %v2033_v63 = vpack.c.bf16 %v378_v26, %v378_v26 }
  0xf3   :  { %1057 = vmatpush.bf16.msrb.mxu1 %v1417_v44  ;;  %v1584_v5 = vld [vmem:[#allocation2 + $0x270] sm:$0xf]  ;;  %v1742_v6 = vld [vmem:[#allocation2 + $0x278] sm:$0xf0]  ;;  %v1489_v10 = vor.u32 %v1718_v4, %v1488_v2  ;;  %v1667_v12 = vld [vmem:[#allocation2 + $0x20] sm:$0xf0] }
  0xf4   :  { %1070 = vmatpush.bf16.msrb.mxu2 %v1513_v35  ;;  %v1380_v13 = vld [vmem:[#allocation2 + $0xd8] sm:$0xf]  ;;  %v1585_v14 = vor.u32 %v1742_v6, %v1584_v5  ;;  %v1691_v15 = vld [vmem:[#allocation2 + $0xe0] sm:$0xf0]  ;;  %v1285_v20 = vor.u32 %v1667_v12, %v1284_v11  ;;  %v1272_v21 = vld [vmem:[#allocation2] sm:$0xf] }
  0xf5   :  { %1083 = vmatpush.bf16.msrb.mxu3 %v1609_v48  ;;  %v1476_v16 = vld [vmem:[#allocation2 + $0x198] sm:$0xf]  ;;  %v1715_v17 = vld [vmem:[#allocation2 + $0x1a0] sm:$0xf0]  ;;  %v1664_v22 = vld [vmem:[#allocation2 + $0x8] sm:$0xf0]  ;;  %v1381_v23 = vor.u32 %v1691_v15, %v1380_v13 }
  0xf6   :  { %1045 = vmatpush.bf16.msrb.mxu0 %v1309_v58  ;;  %v1572_v18 = vld [vmem:[#allocation2 + $0x258] sm:$0xf]  ;;  %v1739_v19 = vld [vmem:[#allocation2 + $0x260] sm:$0xf0]  ;;  %v1477_v24 = vor.u32 %v1715_v17, %v1476_v16  ;;  %v1368_v25 = vld [vmem:[#allocation2 + $0xc0] sm:$0xf]  ;;  %v1273_v39 = vor.u32 %v1664_v22, %v1272_v21 }
  0xf7   :  { %1058 = vmatpush.bf16.msrb.mxu1 %v1405_v59  ;;  %v1688_v27 = vld [vmem:[#allocation2 + $0xc8] sm:$0xf0]  ;;  %v1464_v28 = vld [vmem:[#allocation2 + $0x180] sm:$0xf]  ;;  %v1573_v30 = vor.u32 %v1739_v19, %v1572_v18  ;;  %v1358_v37 = vld [vmem:[#allocation2 + $0xb4] sm:$0xf0] }
  0xf8   :  { %1071 = vmatpush.bf16.msrb.mxu2 %v1501_v60  ;;  %v1712_v31 = vld [vmem:[#allocation2 + $0x188] sm:$0xf0]  ;;  %v1560_v32 = vld [vmem:[#allocation2 + $0x240] sm:$0xf]  ;;  %v1454_v40 = vld [vmem:[#allocation2 + $0x174] sm:$0xf0]  ;;  %v1369_v43 = vor.u32 %v1688_v27, %v1368_v25  ;;  %v2028_v60 = vpack.c.bf16 %v380_v42, %v380_v42  ;;  %v2043_v42 = vpack.c.bf16 %v379_v29, %v379_v29 }
  0xf9   :  { %1084 = vmatpush.bf16.msrb.mxu3 %v1597_v0  ;;  %v1736_v34 = vld [vmem:[#allocation2 + $0x248] sm:$0xf0]  ;;  %v1550_v7 = vld [vmem:[#allocation2 + $0x234] sm:$0xf0]  ;;  %v1465_v33 = vor.u32 %v1712_v31, %v1464_v28  ;;  %v1681_v49 = vld [vmem:[#allocation2 + $0x94] sm:$0xf]  ;;  %v2038_v0 = vpack.c.bf16 %v381_v47, %v381_v47 }
  0xfa   :  { %1046 = vmatpush.bf16.msrb.mxu0 %v1297_v8  ;;  %v1684_v36 = vld [vmem:[#allocation2 + $0xac] sm:$0xf]  ;;  %v1646_v35 = vld [vmem:[#allocation2 + $0x2f4] sm:$0xf0]  ;;  %v1561_v45 = vor.u32 %v1736_v34, %v1560_v32  ;;  %v1346_v50 = vld [vmem:[#allocation2 + $0x9c] sm:$0xf0] }
  0xfb   :  { %1059 = vmatpush.bf16.msrb.mxu1 %v1393_v9  ;;  %v1708_v38 = vld [vmem:[#allocation2 + $0x16c] sm:$0xf]  ;;  %v1361_v3 = vor.u32 %v1684_v36, %v1358_v37  ;;  %v1705_v51 = vld [vmem:[#allocation2 + $0x154] sm:$0xf]  ;;  %v1442_v53 = vld [vmem:[#allocation2 + $0x15c] sm:$0xf0]  ;;  %v1349_v56 = vor.u32 %v1681_v49, %v1346_v50 }
  0xfc   :  { %1072 = vmatpush.bf16.msrb.mxu2 %v1489_v10  ;;  %v1732_v41 = vld [vmem:[#allocation2 + $0x22c] sm:$0xf]  ;;  %v1457_v46 = vor.u32 %v1708_v38, %v1454_v40  ;;  %v1729_v58 = vld [vmem:[#allocation2 + $0x214] sm:$0xf]  ;;  %v1538_v59 = vld [vmem:[#allocation2 + $0x21c] sm:$0xf0]  ;;  %v1445_v1 = vor.u32 %v1705_v51, %v1442_v53 }
  0xfd   :  { %1085 = vmatpush.bf16.msrb.mxu3 %v1585_v14  ;;  %v1756_v44 = vld [vmem:[#allocation2 + $0x2ec] sm:$0xf]  ;;  %v1553_v48 = vor.u32 %v1732_v41, %v1550_v7  ;;  %v1753_v61 = vld [vmem:[#allocation2 + $0x2d4] sm:$0xf]  ;;  %v1634_v62 = vld [vmem:[#allocation2 + $0x2dc] sm:$0xf0]  ;;  %v1541_v54 = vor.u32 %v1729_v58, %v1538_v59 }
  0xfe   :  { %1047 = vmatpush.bf16.msrb.mxu0 %v1285_v20  ;;  %v1649_v52 = vor.u32 %v1756_v44, %v1646_v35  ;;  %v1678_v2 = vld [vmem:[#allocation2 + $0x7c] sm:$0xf]  ;;  %v1334_v26 = vld [vmem:[#allocation2 + $0x84] sm:$0xf0]  ;;  %v1637_v57 = vor.u32 %v1753_v61, %v1634_v62  ;;  %v1675_v11 = vld [vmem:[#allocation2 + $0x64] sm:$0xf] }
  0xff   :  { %1060 = vmatpush.bf16.msrb.mxu1 %v1381_v23  ;;  %v1702_v4 = vld [vmem:[#allocation2 + $0x13c] sm:$0xf]  ;;  %v1430_v5 = vld [vmem:[#allocation2 + $0x144] sm:$0xf0]  ;;  %v1337_v55 = vor.u32 %v1678_v2, %v1334_v26  ;;  %v1322_v12 = vld [vmem:[#allocation2 + $0x6c] sm:$0xf0] }
 0x100   :  { %1073 = vmatpush.bf16.msrb.mxu2 %v1477_v24  ;;  %v1726_v47 = vld [vmem:[#allocation2 + $0x1fc] sm:$0xf]  ;;  %v1526_v6 = vld [vmem:[#allocation2 + $0x204] sm:$0xf0]  ;;  %v1433_v29 = vor.u32 %v1702_v4, %v1430_v5  ;;  %v1699_v13 = vld [vmem:[#allocation2 + $0x124] sm:$0xf]  ;;  %v1325_v20 = vor.u32 %v1675_v11, %v1322_v12 }
 0x101   :  { %1086 = vmatpush.bf16.msrb.mxu3 %v1573_v30  ;;  %v1750_v8 = vld [vmem:[#allocation2 + $0x2bc] sm:$0xf]  ;;  %v1622_v9 = vld [vmem:[#allocation2 + $0x2c4] sm:$0xf0]  ;;  %v1529_v10 = vor.u32 %v1726_v47, %v1526_v6  ;;  %v1418_v15 = vld [vmem:[#allocation2 + $0x12c] sm:$0xf0] }
 0x102   :  { %1048 = vmatpush.bf16.msrb.mxu0 %v1273_v39  ;;  %v1625_v14 = vor.u32 %v1750_v8, %v1622_v9  ;;  %v1723_v16 = vld [vmem:[#allocation2 + $0x1e4] sm:$0xf]  ;;  %v1514_v17 = vld [vmem:[#allocation2 + $0x1ec] sm:$0xf0]  ;;  %v1421_v21 = vor.u32 %v1699_v13, %v1418_v15  ;;  %v1672_v23 = vld [vmem:[#allocation2 + $0x4c] sm:$0xf] }
 0x103   :  { %1061 = vmatpush.bf16.msrb.mxu1 %v1369_v43  ;;  %v1747_v18 = vld [vmem:[#allocation2 + $0x2a4] sm:$0xf]  ;;  %v1610_v19 = vld [vmem:[#allocation2 + $0x2ac] sm:$0xf0]  ;;  %v1517_v22 = vor.u32 %v1723_v16, %v1514_v17  ;;  %v1310_v24 = vld [vmem:[#allocation2 + $0x54] sm:$0xf0] }
 0x104   :  { %1074 = vmatpush.bf16.msrb.mxu2 %v1465_v33  ;;  %v1696_v25 = vld [vmem:[#allocation2 + $0x10c] sm:$0xf]  ;;  %v1613_v27 = vor.u32 %v1747_v18, %v1610_v19  ;;  %v1406_v28 = vld [vmem:[#allocation2 + $0x114] sm:$0xf0]  ;;  %v1313_v36 = vor.u32 %v1672_v23, %v1310_v24  ;;  %v1669_v39 = vld [vmem:[#allocation2 + $0x34] sm:$0xf] }
 0x105   :  { %1087 = vmatpush.bf16.msrb.mxu3 %v1561_v45  ;;  %1049 = vmatmul.bf16.vlgmr.msrb.gmra.mxu0 %v2033_v63  ;;  %v1720_v30 = vld [vmem:[#allocation2 + $0x1cc] sm:$0xf]  ;;  %v1502_v31 = vld [vmem:[#allocation2 + $0x1d4] sm:$0xf0]  ;;  %v1409_v37 = vor.u32 %v1696_v25, %v1406_v28  ;;  %v1298_v40 = vld [vmem:[#allocation2 + $0x3c] sm:$0xf0] }
 0x106   :  { %1093 = vmatpush.bf16.msra.mxu0 %v1361_v3  ;;  %1062 = vmatmul.bf16.vlgmr.msrb.gmra.mxu1 %v2043_v42  ;;  %v1744_v32 = vld [vmem:[#allocation2 + $0x28c] sm:$0xf]  ;;  %v1598_v34 = vld [vmem:[#allocation2 + $0x294] sm:$0xf0]  ;;  %v1505_v38 = vor.u32 %v1720_v30, %v1502_v31  ;;  %v1693_v41 = vld [vmem:[#allocation2 + $0xf4] sm:$0xf]  ;;  %v1301_v3 = vor.u32 %v1669_v39, %v1298_v40 }
 0x107   :  { %1106 = vmatpush.bf16.msra.mxu1 %v1457_v46  ;;  %1075 = vmatmul.bf16.vlgmr.msrb.gmra.mxu2 %v2028_v60  ;;  %v1601_v7 = vor.u32 %v1744_v32, %v1598_v34  ;;  %v1394_v43 = vld [vmem:[#allocation2 + $0xfc] sm:$0xf0]  ;;  %v1717_v33 = vld [vmem:[#allocation2 + $0x1b4] sm:$0xf]  ;;  %v1666_v49 = vld [vmem:[#allocation2 + $0x1c] sm:$0xf] }
 0x108   :  { %1119 = vmatpush.bf16.msra.mxu2 %v1553_v48  ;;  %1088 = vmatmul.bf16.vlgmr.msrb.gmra.mxu3 %v2038_v0  ;;  %v1490_v44 = vld [vmem:[#allocation2 + $0x1bc] sm:$0xf0]  ;;  %v1741_v35 = vld [vmem:[#allocation2 + $0x274] sm:$0xf]  ;;  %v1397_v46 = vor.u32 %v1693_v41, %v1394_v43  ;;  %v1286_v50 = vld [vmem:[#allocation2 + $0x24] sm:$0xf0] }
 0x109   :  { %1132 = vmatpush.bf16.msra.mxu3 %v1649_v52  ;;  %v1586_v45 = vld [vmem:[#allocation2 + $0x27c] sm:$0xf0]  ;;  %v1493_v48 = vor.u32 %v1717_v33, %v1490_v44  ;;  %v1690_v51 = vld [vmem:[#allocation2 + $0xdc] sm:$0xf]  ;;  %v1382_v53 = vld [vmem:[#allocation2 + $0xe4] sm:$0xf0] }
 0x10a   :  { %1094 = vmatpush.bf16.msra.mxu0 %v1349_v56  ;;  %v1589_v52 = vor.u32 %v1741_v35, %v1586_v45  ;;  %v1714_v58 = vld [vmem:[#allocation2 + $0x19c] sm:$0xf]  ;;  %v1478_v59 = vld [vmem:[#allocation2 + $0x1a4] sm:$0xf0]  ;;  %v1289_v56 = vor.u32 %v1666_v49, %v1286_v50  ;;  %v1385_v2 = vor.u32 %v1690_v51, %v1382_v53  ;;  %v1687_v4 = vld [vmem:[#allocation2 + $0xc4] sm:$0xf] }
 0x10b   :  { %1107 = vmatpush.bf16.msra.mxu1 %v1445_v1  ;;  %v1738_v61 = vld [vmem:[#allocation2 + $0x25c] sm:$0xf]  ;;  %v1574_v62 = vld [vmem:[#allocation2 + $0x264] sm:$0xf0]  ;;  %v1663_v1 = vld [vmem:[#allocation2 + $0x4] sm:$0xf]  ;;  %v1481_v26 = vor.u32 %v1714_v58, %v1478_v59 }
 0x10c   :  { %1120 = vmatpush.bf16.msra.mxu2 %v1541_v54  ;;  %v1274_v54 = vld [vmem:[#allocation2 + $0xc] sm:$0xf0]  ;;  %v1711_v5 = vld [vmem:[#allocation2 + $0x184] sm:$0xf]  ;;  %v1577_v47 = vor.u32 %v1738_v61, %v1574_v62  ;;  %v1710_v12 = vld [vmem:[#allocation2 + $0x178] sm:$0xf0] }
 0x10d   :  { %1133 = vmatpush.bf16.msra.mxu3 %v1637_v57  ;;  %v1370_v57 = vld [vmem:[#allocation2 + $0xcc] sm:$0xf0]  ;;  %v1735_v8 = vld [vmem:[#allocation2 + $0x244] sm:$0xf]  ;;  %v1277_v11 = vor.u32 %v1663_v1, %v1274_v54  ;;  %v1758_v18 = vld [vmem:[#allocation2 + $0x2f8] sm:$0xf0] }
 0x10e   :  { %1095 = vmatpush.bf16.msra.mxu0 %v1337_v55  ;;  %v1466_v6 = vld [vmem:[#allocation2 + $0x18c] sm:$0xf0]  ;;  %v1373_v15 = vor.u32 %v1687_v4, %v1370_v57  ;;  %v1352_v23 = vld [vmem:[#allocation2 + $0x98] sm:$0xf]  ;;  %v1683_v24 = vld [vmem:[#allocation2 + $0xa0] sm:$0xf0] }
 0x10f   :  { %1108 = vmatpush.bf16.msra.mxu1 %v1433_v29  ;;  %v1562_v9 = vld [vmem:[#allocation2 + $0x24c] sm:$0xf0]  ;;  %v1686_v29 = vld [vmem:[#allocation2 + $0xb8] sm:$0xf0]  ;;  %v1469_v16 = vor.u32 %v1711_v5, %v1466_v6  ;;  %v1448_v25 = vld [vmem:[#allocation2 + $0x158] sm:$0xf] }
 0x110   :  { %1121 = vmatpush.bf16.msra.mxu2 %v1529_v10  ;;  %v1364_v55 = vld [vmem:[#allocation2 + $0xb0] sm:$0xf]  ;;  %v1565_v19 = vor.u32 %v1735_v8, %v1562_v9  ;;  %v1707_v28 = vld [vmem:[#allocation2 + $0x160] sm:$0xf0]  ;;  %v1544_v30 = vld [vmem:[#allocation2 + $0x218] sm:$0xf] }
 0x111   :  { %1134 = vmatpush.bf16.msra.mxu3 %v1625_v14  ;;  %v1460_v10 = vld [vmem:[#allocation2 + $0x170] sm:$0xf]  ;;  %v1734_v14 = vld [vmem:[#allocation2 + $0x238] sm:$0xf0]  ;;  %v1731_v31 = vld [vmem:[#allocation2 + $0x220] sm:$0xf0] }
 0x112   :  { %1096 = vmatpush.bf16.msra.mxu0 %v1325_v20  ;;  %v1556_v13 = vld [vmem:[#allocation2 + $0x230] sm:$0xf]  ;;  %v1365_v20 = vor.u32 %v1686_v29, %v1364_v55  ;;  %v1640_v32 = vld [vmem:[#allocation2 + $0x2d8] sm:$0xf]  ;;  %v1755_v34 = vld [vmem:[#allocation2 + $0x2e0] sm:$0xf0] }
 0x113   :  { %1109 = vmatpush.bf16.msra.mxu1 %v1421_v21  ;;  %v1652_v17 = vld [vmem:[#allocation2 + $0x2f0] sm:$0xf]  ;;  %v1461_v21 = vor.u32 %v1710_v12, %v1460_v10  ;;  %v1340_v39 = vld [vmem:[#allocation2 + $0x80] sm:$0xf]  ;;  %v1680_v40 = vld [vmem:[#allocation2 + $0x88] sm:$0xf0] }
 0x114   :  { %1122 = vmatpush.bf16.msra.mxu2 %v1517_v22  ;;  %v1557_v22 = vor.u32 %v1734_v14, %v1556_v13  ;;  %v1436_v41 = vld [vmem:[#allocation2 + $0x140] sm:$0xf]  ;;  %v1704_v43 = vld [vmem:[#allocation2 + $0x148] sm:$0xf0]  ;;  %v1328_v49 = vld [vmem:[#allocation2 + $0x68] sm:$0xf] }
 0x115   :  { %1135 = vmatpush.bf16.msra.mxu3 %v1613_v27  ;;  %v1653_v27 = vor.u32 %v1758_v18, %v1652_v17  ;;  %v1532_v33 = vld [vmem:[#allocation2 + $0x200] sm:$0xf]  ;;  %v1728_v44 = vld [vmem:[#allocation2 + $0x208] sm:$0xf0]  ;;  %v1677_v50 = vld [vmem:[#allocation2 + $0x70] sm:$0xf0] }
 0x116   :  { %1097 = vmatpush.bf16.msra.mxu0 %v1313_v36  ;;  %v1353_v36 = vor.u32 %v1683_v24, %v1352_v23  ;;  %v1628_v35 = vld [vmem:[#allocation2 + $0x2c0] sm:$0xf]  ;;  %v1752_v45 = vld [vmem:[#allocation2 + $0x2c8] sm:$0xf0]  ;;  %v1424_v51 = vld [vmem:[#allocation2 + $0x128] sm:$0xf] }
 0x117   :  { %1110 = vmatpush.bf16.msra.mxu1 %v1409_v37  ;;  %v1449_v37 = vor.u32 %v1707_v28, %v1448_v25  ;;  %v1701_v53 = vld [vmem:[#allocation2 + $0x130] sm:$0xf0]  ;;  %v1520_v58 = vld [vmem:[#allocation2 + $0x1e8] sm:$0xf]  ;;  %v1412_v4 = vld [vmem:[#allocation2 + $0x110] sm:$0xf] }
 0x118   :  { %1123 = vmatpush.bf16.msra.mxu2 %v1505_v38  ;;  %v1545_v38 = vor.u32 %v1731_v31, %v1544_v30  ;;  %v1725_v59 = vld [vmem:[#allocation2 + $0x1f0] sm:$0xf0]  ;;  %v1616_v61 = vld [vmem:[#allocation2 + $0x2a8] sm:$0xf]  ;;  %v1425_v1 = vor.u32 %v1701_v53, %v1424_v51  ;;  %v1698_v5 = vld [vmem:[#allocation2 + $0x118] sm:$0xf0] }
 0x119   :  { %1136 = vmatpush.bf16.msra.mxu3 %v1601_v7  ;;  %v1641_v7 = vor.u32 %v1755_v34, %v1640_v32  ;;  %v1749_v62 = vld [vmem:[#allocation2 + $0x2b0] sm:$0xf0]  ;;  %v1521_v54 = vor.u32 %v1725_v59, %v1520_v58  ;;  %v1722_v6 = vld [vmem:[#allocation2 + $0x1d8] sm:$0xf0]  ;;  %v1604_v8 = vld [vmem:[#allocation2 + $0x290] sm:$0xf]  ;;  %v1413_v29 = vor.u32 %v1698_v5, %v1412_v4 }
 0x11a   :  { %1098 = vmatpush.bf16.msra.mxu0 %v1301_v3  ;;  %v1341_v3 = vor.u32 %v1680_v40, %v1340_v39  ;;  %v1617_v57 = vor.u32 %v1749_v62, %v1616_v61  ;;  %v1746_v9 = vld [vmem:[#allocation2 + $0x298] sm:$0xf0]  ;;  %v1671_v12 = vld [vmem:[#allocation2 + $0x40] sm:$0xf0]  ;;  %v1400_v13 = vld [vmem:[#allocation2 + $0xf8] sm:$0xf] }
 0x11b   :  { %1111 = vmatpush.bf16.msra.mxu1 %v1397_v46  ;;  %v1437_v46 = vor.u32 %v1704_v43, %v1436_v41  ;;  %v1605_v14 = vor.u32 %v1746_v9, %v1604_v8  ;;  %v1719_v17 = vld [vmem:[#allocation2 + $0x1c0] sm:$0xf0]  ;;  %v1592_v18 = vld [vmem:[#allocation2 + $0x278] sm:$0xf]  ;;  %v1292_v23 = vld [vmem:[#allocation2 + $0x20] sm:$0xf] }
 0x11c   :  { %1124 = vmatpush.bf16.msra.mxu2 %v1493_v48  ;;  %v1533_v48 = vor.u32 %v1728_v44, %v1532_v33  ;;  %v1668_v24 = vld [vmem:[#allocation2 + $0x28] sm:$0xf0]  ;;  %v1388_v25 = vld [vmem:[#allocation2 + $0xe0] sm:$0xf]  ;;  %v1280_v39 = vld [vmem:[#allocation2 + $0x8] sm:$0xf] }
 0x11d   :  { %1137 = vmatpush.bf16.msra.mxu3 %v1589_v52  ;;  %v1629_v52 = vor.u32 %v1752_v45, %v1628_v35  ;;  %v1692_v28 = vld [vmem:[#allocation2 + $0xe8] sm:$0xf0]  ;;  %v1484_v30 = vld [vmem:[#allocation2 + $0x1a0] sm:$0xf]  ;;  %v1665_v40 = vld [vmem:[#allocation2 + $0x10] sm:$0xf0] }
 0x11e   :  { %1099 = vmatpush.bf16.msra.mxu0 %v1289_v56  ;;  %v1329_v56 = vor.u32 %v1677_v50, %v1328_v49  ;;  %v1716_v31 = vld [vmem:[#allocation2 + $0x1a8] sm:$0xf0]  ;;  %v1580_v32 = vld [vmem:[#allocation2 + $0x260] sm:$0xf]  ;;  %v1376_v41 = vld [vmem:[#allocation2 + $0xc8] sm:$0xf] }
 0x11f   :  { %1112 = vmatpush.bf16.msra.mxu1 %v1385_v2  ;;  %v1316_v2 = vld [vmem:[#allocation2 + $0x50] sm:$0xf]  ;;  %v1740_v34 = vld [vmem:[#allocation2 + $0x268] sm:$0xf0]  ;;  %v1689_v43 = vld [vmem:[#allocation2 + $0xd0] sm:$0xf0] }
 0x120   :  { %1125 = vmatpush.bf16.msra.mxu2 %v1481_v26  ;;  %v1674_v26 = vld [vmem:[#allocation2 + $0x58] sm:$0xf0]  ;;  %v1472_v33 = vld [vmem:[#allocation2 + $0x188] sm:$0xf]  ;;  %v1713_v44 = vld [vmem:[#allocation2 + $0x190] sm:$0xf0] }
 0x121   :  { %1138 = vmatpush.bf16.msra.mxu3 %v1577_v47  ;;  %v1508_v47 = vld [vmem:[#allocation2 + $0x1d0] sm:$0xf]  ;;  %v1317_v55 = vor.u32 %v1674_v26, %v1316_v2  ;;  %v1568_v35 = vld [vmem:[#allocation2 + $0x248] sm:$0xf]  ;;  %v1737_v45 = vld [vmem:[#allocation2 + $0x250] sm:$0xf0] }
 0x122   :  { %1100 = vmatpush.bf16.msra.mxu0 %v1277_v11  ;;  %v1509_v10 = vor.u32 %v1722_v6, %v1508_v47  ;;  %v1304_v11 = vld [vmem:[#allocation2 + $0x38] sm:$0xf]  ;;  %v1569_v49 = vor.u32 %v1737_v45, %v1568_v35  ;;  %vm1219_vm0 = vcmask 7168  }
 0x123   :  { %1113 = vmatpush.bf16.msra.mxu1 %v1373_v15  ;;  %v1695_v15 = vld [vmem:[#allocation2 + $0x100] sm:$0xf0] }
 0x124   :  { %1126 = vmatpush.bf16.msra.mxu2 %v1469_v16  ;;  %v1496_v16 = vld [vmem:[#allocation2 + $0x1b8] sm:$0xf] }
 0x125   :  { %1139 = vmatpush.bf16.msra.mxu3 %v1565_v19  ;;  %1101 = vmatmul.bf16.vlgmr.msra.gmra.mxu0 %v2033_v63  ;;  %v1743_v19 = vld [vmem:[#allocation2 + $0x280] sm:$0xf0] }
 0x126   :  { %1145 = vmatpush.bf16.msrb.mxu0 %v1365_v20  ;;  %1114 = vmatmul.bf16.vlgmr.msra.gmra.mxu1 %v2043_v42  ;;  %v1305_v20 = vor.u32 %v1671_v12, %v1304_v11 }
 0x127   :  { %1158 = vmatpush.bf16.msrb.mxu1 %v1461_v21  ;;  %1127 = vmatmul.bf16.vlgmr.msra.gmra.mxu2 %v2028_v60  ;;  %v1401_v21 = vor.u32 %v1695_v15, %v1400_v13 }
 0x128   :  { %1171 = vmatpush.bf16.msrb.mxu2 %v1557_v22  ;;  %1140 = vmatmul.bf16.vlgmr.msra.gmra.mxu3 %v2038_v0  ;;  %v1497_v22 = vor.u32 %v1719_v17, %v1496_v16 }
 0x129   :  { %1184 = vmatpush.bf16.msrb.mxu3 %v1653_v27  ;;  %v1593_v27 = vor.u32 %v1743_v19, %v1592_v18 }
 0x12a   :  { %1146 = vmatpush.bf16.msrb.mxu0 %v1353_v36  ;;  %v1293_v36 = vor.u32 %v1668_v24, %v1292_v23 }
 0x12b   :  { %1159 = vmatpush.bf16.msrb.mxu1 %v1449_v37  ;;  %v1389_v37 = vor.u32 %v1692_v28, %v1388_v25 }
 0x12c   :  { %1172 = vmatpush.bf16.msrb.mxu2 %v1545_v38  ;;  %v1485_v38 = vor.u32 %v1716_v31, %v1484_v30 }
 0x12d   :  { %1185 = vmatpush.bf16.msrb.mxu3 %v1641_v7  ;;  %v1581_v7 = vor.u32 %v1740_v34, %v1580_v32 }
 0x12e   :  { %1147 = vmatpush.bf16.msrb.mxu0 %v1341_v3  ;;  %v1281_v3 = vor.u32 %v1665_v40, %v1280_v39 }
 0x12f   :  { %1160 = vmatpush.bf16.msrb.mxu1 %v1437_v46  ;;  %v1377_v46 = vor.u32 %v1689_v43, %v1376_v41 }
 0x130   :  { %1173 = vmatpush.bf16.msrb.mxu2 %v1533_v48  ;;  %v1473_v48 = vor.u32 %v1713_v44, %v1472_v33  ;;  %v1217_v44 = vstv %s2067_s4 }
 0x131   :  { %1186 = vmatpush.bf16.msrb.mxu3 %v1629_v52 }
 0x132   :  { %1148 = vmatpush.bf16.msrb.mxu0 %v1329_v56 }
 0x133   :  { %1161 = vmatpush.bf16.msrb.mxu1 %v1425_v1 }
 0x134   :  { %1174 = vmatpush.bf16.msrb.mxu2 %v1521_v54 }
 0x135   :  { %1187 = vmatpush.bf16.msrb.mxu3 %v1617_v57 }
 0x136   :  { %1149 = vmatpush.bf16.msrb.mxu0 %v1317_v55 }
 0x137   :  { %1162 = vmatpush.bf16.msrb.mxu1 %v1413_v29 }
 0x138   :  { %1175 = vmatpush.bf16.msrb.mxu2 %v1509_v10 }
 0x139   :  { %1188 = vmatpush.bf16.msrb.mxu3 %v1605_v14 }
 0x13a   :  { %1150 = vmatpush.bf16.msrb.mxu0 %v1305_v20 }
 0x13b   :  { %1163 = vmatpush.bf16.msrb.mxu1 %v1401_v21 }
 0x13c   :  { %1176 = vmatpush.bf16.msrb.mxu2 %v1497_v22 }
 0x13d   :  { %1189 = vmatpush.bf16.msrb.mxu3 %v1593_v27 }
 0x13e   :  { %1151 = vmatpush.bf16.msrb.mxu0 %v1293_v36 }
 0x13f   :  { %1164 = vmatpush.bf16.msrb.mxu1 %v1389_v37 }
 0x140   :  { %1177 = vmatpush.bf16.msrb.mxu2 %v1485_v38 }
 0x141   :  { %1190 = vmatpush.bf16.msrb.mxu3 %v1581_v7 }
 0x142   :  { %1152 = vmatpush.bf16.msrb.mxu0 %v1281_v3 }
 0x143   :  { %1165 = vmatpush.bf16.msrb.mxu1 %v1377_v46 }
 0x144   :  { %1178 = vmatpush.bf16.msrb.mxu2 %v1473_v48 }
 0x145   :  { %1191 = vmatpush.bf16.msrb.mxu3 %v1569_v49  ;;  %1153 = vmatmul.bf16.vlgmr.msrb.gmra.mxu0 %v2033_v63  ;;  %v386_v63 = vld [vmem:[#allocation10] sm:$0x3f] }
 0x146   :  { %1166 = vmatmul.bf16.vlgmr.msrb.gmra.mxu1 %v2043_v42  ;;  %v521_v42 = vperm.slane %v386_v63, 2  ;;  %v520_v57 = vperm.slane %v386_v63, 0  ;;  %v522_v9 = vperm.slane %v386_v63, 4  ;;  %v1201_v17 = vperm.slane %v386_v63, 3 }
 0x147   :  { %1179 = vmatmul.bf16.vlgmr.msrb.gmra.mxu2 %v2028_v60  ;;  %v1200_v19 = vperm.slane %v386_v63, 1  ;;  %v1202_v23 = vperm.slane %v386_v63, 5 }
 0x148   :  { %1192 = vmatmul.bf16.vlgmr.msrb.gmra.mxu3 %v2038_v0  ;;  %v527_v5 = vperm.slane %v521_v42, 0  ;;  %v526_v47 = vperm.slane %v520_v57, 0  ;;  %v528_v10 = vperm.slane %v522_v9, 0  ;;  %v1207_v22 = vperm.slane %v1201_v17, 1 }
 0x149   :  { %v1206_v27 = vperm.slane %v1200_v19, 1  ;;  %v1208_v37 = vperm.slane %v1202_v23, 1 }
 0x182   :  { %v1050_v50 = vpop.f32.mrf.mxu0 }
 0x183   :  { %v1063_v51 = vpop.f32.mrf.mxu1  ;;  %v1051_v8 = vadd.f32 %v1050_v50, %v526_v47 }
 0x185   :  { %v1064_v29 = vadd.f32 %v1063_v51, %v1051_v8 }
 0x18a   :  { %v1076_v52 = vpop.f32.mrf.mxu2  ;;  %v1052_v58 = vpop.f32.mrf.mxu0 }
 0x18b   :  { %v1089_v53 = vpop.f32.mrf.mxu3  ;;  %v1065_v59 = vpop.f32.mrf.mxu1  ;;  %v1077_v12 = vadd.f32 %v1076_v52, %v1064_v29 }
 0x18d   :  { %v1090_v18 = vadd.f32 %v1089_v53, %v1077_v12 }
 0x18f   :  { %v1197_v25 = vmax.f32 %v1090_v18, 0.0 }
 0x191   :  { %v1209_v38 = vmul.f32 %v1206_v27, %v1197_v25 }
 0x192   :  { %v1078_v61 = vpop.f32.mrf.mxu2 }
 0x193   :  { %v1091_v62 = vpop.f32.mrf.mxu3 }
 0x1a2   :  { %v1102_v56 = vpop.f32.mrf.mxu0 }
 0x1a3   :  { %v1115_v1 = vpop.f32.mrf.mxu1  ;;  %v1103_v6 = vadd.f32 %v1102_v56, %v527_v5 }
 0x1a5   :  { %v1116_v55 = vadd.f32 %v1115_v1, %v1103_v6 }
 0x1aa   :  { %v1128_v54 = vpop.f32.mrf.mxu2  ;;  %v1104_v26 = vpop.f32.mrf.mxu0 }
 0x1ab   :  { %v1141_v2 = vpop.f32.mrf.mxu3  ;;  %v1117_v4 = vpop.f32.mrf.mxu1  ;;  %v1129_v11 = vadd.f32 %v1128_v54, %v1116_v55 }
 0x1ad   :  { %v1142_v16 = vadd.f32 %v1141_v2, %v1129_v11 }
 0x1af   :  { %v1198_v21 = vmax.f32 %v1142_v16, 0.0 }
 0x1b1   :  { %v1210_v34 = vmul.f32 %v1207_v22, %v1198_v21 }
 0x1b2   :  { %v1130_v60 = vpop.f32.mrf.mxu2 }
 0x1b3   :  { %v1143_v0 = vpop.f32.mrf.mxu3  ;;  %v1212_v41 = vadd.f32 %v1210_v34, %v1209_v38 }
 0x1c2   :  { %v1154_v13 = vpop.f32.mrf.mxu0 }
 0x1c3   :  { %v1155_v14 = vadd.f32 %v1154_v13, %v528_v10  ;;  %v1167_v15 = vpop.f32.mrf.mxu1 }
 0x1c5   :  { %v1168_v20 = vadd.f32 %v1167_v15, %v1155_v14 }
 0x1ca   :  { %v1180_v24 = vpop.f32.mrf.mxu2  ;;  %v1156_v31 = vpop.f32.mrf.mxu0 }
 0x1cb   :  { %v1181_v28 = vadd.f32 %v1180_v24, %v1168_v20  ;;  %v1193_v30 = vpop.f32.mrf.mxu3  ;;  %v1169_v32 = vpop.f32.mrf.mxu1 }
 0x1cd   :  { %v1194_v36 = vadd.f32 %v1193_v30, %v1181_v28 }
 0x1cf   :  { %v1199_v39 = vmax.f32 %v1194_v36, 0.0 }
 0x1d1   :  { %v1211_v40 = vmul.f32 %v1208_v37, %v1199_v39 }
 0x1d2   :  { %v1182_v7 = vpop.f32.mrf.mxu2 }
 0x1d3   :  { %v1195_v43 = vpop.f32.mrf.mxu3  ;;  %v1213_v33 = vadd.f32 %v1212_v41, %v1211_v40 }
 0x1d5   :  { %1214 = vadd.xlane.f32.xlu0 %v1213_v33 }
 0x248   :  { %v1215_v35 = vpop.xlane.xlu0 %1214 }
 0x249   :  { %v1218_v45 = vadd.f32 %v1217_v44, %v1215_v35 }
 0x24b   :  { %1220 = vst.msk [vmem:[%s2069_s6] sm:$0xff] %vm1219_vm0, %v1218_v45 }
 0x24c   :  { %1225 = vsyncpa [#allocation6], 1 }
 0x24d   :  { %1226 = vsyncpa [#allocation8], 1 }
 0x24e   :  { %1227 = vsyncpa [#allocation11], 1 }
 0x24f   :  { %1228 = vsyncmov [#allocation3] }
 0x252   :  { %s1229_s23 = vpop.sfrf %1228 }
 0x253   :  { %p1654_p0 = scmp.ne.s32.totalorder %s1229_s23, 0 }
 0x255   :  { %1233 = shalt.err (%p1654_p0)  }

</bundles_post_ra>
